<compile_context>
chip_gen: v7x
topology: tpu7x:2x2x1
jax: 0.10.0
libtpu: 0.0.40
codegen_flags: <defaults>
</compile_context>

<pallas_src>
import functools

import jax
import jax.numpy as jnp
from jax.experimental import pallas as pl
from jax.experimental.pallas import tpu as pltpu


def _round_up(n, m):
    return ((n + m - 1) // m) * m


def _cdiv(a, b):
    return -(-a // b)


def upn_kernel(x_ref, w1_ref, b1_ref, w2_ref, b2_ref, o_ref, *, matmul_dtype):
    # x_ref:  (TB, input_size)           f32 (cast to matmul_dtype in-register)
    # w1_ref: (input_size, hidden)       matmul dtype
    # b1_ref: (1, hidden)                f32
    # w2_ref: (hidden, pattern)          matmul dtype
    # b2_ref: (1, pattern)               f32
    # o_ref:  (TB, pattern)
    x = x_ref[...]
    if matmul_dtype is not None:
        x = x.astype(matmul_dtype)                       # in-kernel cast: no extra HBM pass
    h = jnp.dot(x, w1_ref[...], preferred_element_type=jnp.float32)
    h = jnp.maximum(h + b1_ref[...], 0.0)                # f32 VPU math (v5e-safe)
    y = jnp.dot(h.astype(w2_ref.dtype), w2_ref[...],     # MXU in weight dtype, f32 acc
                preferred_element_type=jnp.float32) + b2_ref[...]
    o_ref[...] = jnp.tanh(y).astype(o_ref.dtype)         # EUP tanh in f32


def upn_forward(x, w1, b1, w2, b2, *, block_batch=4096, matmul_dtype=jnp.bfloat16,
                out_dtype=None, buffer_count=None):
    """Fused UPN forward.

    matmul_dtype: dtype for MXU operands (default bf16 on all TPU generations;
                  None keeps the input/weight dtype, e.g. full f32).
    out_dtype:    output dtype (default: x.dtype); bf16 halves writeback bytes.
    buffer_count: optional pipeline depth for the streamed x / out tiles
                  (None = Pallas default double buffering).
    """
    B, in_size = x.shape
    hidden = w1.shape[1]
    pattern = w2.shape[1]
    out_dtype = x.dtype if out_dtype is None else out_dtype

    # Weights are tiny: casting them in the wrapper is negligible.  x stays f32
    # and is cast inside the kernel (saves a full HBM pass over x).
    if matmul_dtype is not None:
        w1 = w1.astype(matmul_dtype)
        w2 = w2.astype(matmul_dtype)
    b1 = b1.astype(jnp.float32).reshape(1, hidden)
    b2 = b2.astype(jnp.float32).reshape(1, pattern)

    # Batch tile: sublane-aligned, capped at block_batch.  No wrapper-side pad:
    # the ragged last block reads OOB garbage rows that are never written back.
    tb = _round_up(min(block_batch, _round_up(B, 8)), 8)
    nsteps = _cdiv(B, tb)
    # v7x has 2 TensorCores sharing the "parallel" axis: prefer an even step count.
    if nsteps > 1 and nsteps % 2 == 1:
        tb_even = _round_up(_cdiv(B, nsteps + 1), 8)
        if _cdiv(B, tb_even) % 2 == 0:
            tb = tb_even
            nsteps = _cdiv(B, tb)
    grid = (nsteps,)

    def _spec(shape, index_map, streamed):
        if streamed and buffer_count is not None:
            return pl.BlockSpec(shape, index_map, pipeline_mode=pl.Buffered(buffer_count))
        return pl.BlockSpec(shape, index_map)

    out = pl.pallas_call(
        functools.partial(upn_kernel, matmul_dtype=matmul_dtype),
        out_shape=jax.ShapeDtypeStruct((B, pattern), out_dtype),
        grid=grid,
        in_specs=[
            _spec((tb, in_size), lambda i: (i, 0), True),      # batch-tiled x (streamed)
            _spec((in_size, hidden), lambda i: (0, 0), False),  # resident weights
            _spec((1, hidden), lambda i: (0, 0), False),
            _spec((hidden, pattern), lambda i: (0, 0), False),
            _spec((1, pattern), lambda i: (0, 0), False),
        ],
        out_specs=_spec((tb, pattern), lambda i: (i, 0), True),  # real-width output
        compiler_params=pltpu.CompilerParams(
            dimension_semantics=("parallel",)),                  # independent batch tiles
    )(x, w1, b1, w2, b2)
    return out


def init_upn_params(key, input_size, pattern_size, dtype=jnp.float32):
    """Deterministic init mirroring nn.Linear default (uniform +-1/sqrt(fan_in))."""
    hidden = pattern_size * 2
    k1, k2, k3, k4 = jax.random.split(key, 4)
    bound1 = 1.0 / jnp.sqrt(jnp.array(input_size, dtype))
    bound2 = 1.0 / jnp.sqrt(jnp.array(hidden, dtype))
    # weights stored as [in, out] (transpose of PyTorch's [out, in])
    w1 = jax.random.uniform(k1, (input_size, hidden), dtype, -bound1, bound1)
    b1 = jax.random.uniform(k2, (1, hidden), dtype, -bound1, bound1)
    w2 = jax.random.uniform(k3, (hidden, pattern_size), dtype, -bound2, bound2)
    b2 = jax.random.uniform(k4, (1, pattern_size), dtype, -bound2, bound2)
    return w1, b1, w2, b2


if __name__ == "__main__":
    key = jax.random.PRNGKey(0)
    kx, kp = jax.random.split(key)

    batch = 2
    input_size = 32
    pattern_size = 16

    x = jax.random.normal(kx, (batch, input_size), jnp.float32)
    w1, b1, w2, b2 = init_upn_params(kp, input_size, pattern_size)

    # Small-shape full-f32 path (strict correctness check).
    out = jax.block_until_ready(upn_forward(x, w1, b1, w2, b2, matmul_dtype=None))
    ref = jnp.tanh(jnp.maximum(x @ w1 + b1, 0.0) @ w2 + b2)
    assert out.shape == (batch, pattern_size)
    assert jnp.allclose(out, ref, atol=1e-5, rtol=1e-5)

    # Larger ragged batch: default bf16 MXU path + bf16 output (looser tolerance).
    xb = jax.random.normal(kx, (513, input_size), jnp.float32)
    outb = jax.block_until_ready(
        upn_forward(xb, w1, b1, w2, b2, block_batch=256, out_dtype=jnp.bfloat16))
    refb = jnp.tanh(jnp.maximum(xb @ w1 + b1, 0.0) @ w2 + b2)
    assert outb.shape == (513, pattern_size)
    assert outb.dtype == jnp.bfloat16
    assert jnp.allclose(outb.astype(jnp.float32), refb, atol=1e-1, rtol=1e-1)

    print("KERNEL_OK")
</pallas_src>

<mosaic_0001>
module attributes {stable_mosaic.version = 11 : i64} {
  func.func @upn_kernel(%arg0: i32, %arg1: memref<8x32xf32, #tpu.memory_space<vmem>>, %arg2: memref<32x32xf32, #tpu.memory_space<vmem>>, %arg3: memref<1x32xf32, #tpu.memory_space<vmem>>, %arg4: memref<32x16xf32, #tpu.memory_space<vmem>>, %arg5: memref<1x16xf32, #tpu.memory_space<vmem>>, %arg6: memref<8x16xf32, #tpu.memory_space<vmem>>) attributes {dimension_semantics = [#tpu.dimension_semantics<parallel>], iteration_bounds = array<i64: 1>, scalar_prefetch = 0 : i64, scratch_operands = 0 : i64, tpu.core_type = #tpu.core_type<tc>, window_params = [{transform_indices = @transform_0, window_bounds = array<i64: 8, 32>}, {pipeline_mode = #tpu.pipeline_mode<synchronous>, transform_indices = @transform_1, window_bounds = array<i64: 32, 32>}, {pipeline_mode = #tpu.pipeline_mode<synchronous>, transform_indices = @transform_2, window_bounds = array<i64: 1, 32>}, {pipeline_mode = #tpu.pipeline_mode<synchronous>, transform_indices = @transform_3, window_bounds = array<i64: 32, 16>}, {pipeline_mode = #tpu.pipeline_mode<synchronous>, transform_indices = @transform_4, window_bounds = array<i64: 1, 16>}, {transform_indices = @transform_5, window_bounds = array<i64: 8, 16>}]} {
    %c0 = arith.constant 0 : index
    %c0_0 = arith.constant 0 : index
    %0 = vector.load %arg1[%c0, %c0_0] : memref<8x32xf32, #tpu.memory_space<vmem>>, vector<8x32xf32>
    %c0_1 = arith.constant 0 : index
    %c0_2 = arith.constant 0 : index
    %1 = vector.load %arg2[%c0_1, %c0_2] : memref<32x32xf32, #tpu.memory_space<vmem>>, vector<32x32xf32>
    %cst = arith.constant dense<0.000000e+00> : vector<8x32xf32>
    %2 = tpu.matmul %0, %1, %cst {dimension_numbers = #tpu.dot_dimension_numbers<[1], [0], [0], [1], [0, 0, 1, 1], [], []>} : vector<8x32xf32>, vector<32x32xf32>, vector<8x32xf32> -> vector<8x32xf32>
    %c0_3 = arith.constant 0 : index
    %c0_4 = arith.constant 0 : index
    %3 = vector.load %arg3[%c0_3, %c0_4] : memref<1x32xf32, #tpu.memory_space<vmem>>, vector<1x32xf32>
    %4 = vector.broadcast %3 : vector<1x32xf32> to vector<8x32xf32>
    %5 = arith.addf %2, %4 : vector<8x32xf32>
    %cst_5 = arith.constant 0.000000e+00 : f32
    %6 = vector.broadcast %cst_5 : f32 to vector<8x32xf32>
    %7 = arith.maximumf %5, %6 : vector<8x32xf32>
    %c0_6 = arith.constant 0 : index
    %c0_7 = arith.constant 0 : index
    %8 = vector.load %arg4[%c0_6, %c0_7] : memref<32x16xf32, #tpu.memory_space<vmem>>, vector<32x16xf32>
    %cst_8 = arith.constant dense<0.000000e+00> : vector<8x16xf32>
    %9 = tpu.matmul %7, %8, %cst_8 {dimension_numbers = #tpu.dot_dimension_numbers<[1], [0], [0], [1], [0, 0, 1, 1], [], []>} : vector<8x32xf32>, vector<32x16xf32>, vector<8x16xf32> -> vector<8x16xf32>
    %c0_9 = arith.constant 0 : index
    %c0_10 = arith.constant 0 : index
    %10 = vector.load %arg5[%c0_9, %c0_10] : memref<1x16xf32, #tpu.memory_space<vmem>>, vector<1x16xf32>
    %11 = vector.broadcast %10 : vector<1x16xf32> to vector<8x16xf32>
    %12 = arith.addf %9, %11 : vector<8x16xf32>
    %13 = math.tanh %12 : vector<8x16xf32>
    %c0_11 = arith.constant 0 : index
    %c0_12 = arith.constant 0 : index
    %14 = vector.load %arg6[%c0_11, %c0_12] : memref<8x16xf32, #tpu.memory_space<vmem>>, vector<8x16xf32>
    tpu.vector_store %arg6[%c0_11, %c0_12], %13 {strides = array<i32>} : memref<8x16xf32, #tpu.memory_space<vmem>>, vector<8x16xf32>,
    return
  }
  func.func @transform_0(%arg0: i32) -> (i32, i32) {
    %c0_i32 = arith.constant 0 : i32
    %c0_i32_0 = arith.constant 0 : i32
    return %arg0, %c0_i32 : i32, i32
  }
  func.func @transform_1(%arg0: i32) -> (i32, i32) {
    %c0_i32 = arith.constant 0 : i32
    %c0_i32_0 = arith.constant 0 : i32
    %c0_i32_1 = arith.constant 0 : i32
    return %c0_i32, %c0_i32_0 : i32, i32
  }
  func.func @transform_2(%arg0: i32) -> (i32, i32) {
    %c0_i32 = arith.constant 0 : i32
    %c0_i32_0 = arith.constant 0 : i32
    %c0_i32_1 = arith.constant 0 : i32
    return %c0_i32, %c0_i32_0 : i32, i32
  }
  func.func @transform_3(%arg0: i32) -> (i32, i32) {
    %c0_i32 = arith.constant 0 : i32
    %c0_i32_0 = arith.constant 0 : i32
    %c0_i32_1 = arith.constant 0 : i32
    return %c0_i32, %c0_i32_0 : i32, i32
  }
  func.func @transform_4(%arg0: i32) -> (i32, i32) {
    %c0_i32 = arith.constant 0 : i32
    %c0_i32_0 = arith.constant 0 : i32
    %c0_i32_1 = arith.constant 0 : i32
    return %c0_i32, %c0_i32_0 : i32, i32
  }
  func.func @transform_5(%arg0: i32) -> (i32, i32) {
    %c0_i32 = arith.constant 0 : i32
    %c0_i32_0 = arith.constant 0 : i32
    return %arg0, %c0_i32 : i32, i32
  }
}

</mosaic_0001>

<bundles_post_ra>
// kernel: tpu_custom_call.1
= control target key start
LH: loop header
LB: loop body
LE: loop exit
PB: predicated region body
PF: predicated region fallthrough
CT: control target
= control target key end

     0   :  { %10 = vsyncpa [#allocation3], 0  ;;  %v291_v2 = vmov 0.0|0.0   ;;  %vm292_vm0 = vmmov 0   ;;  %v293_v6 = vmov 0.0   ;;  %vm33_vm1 = vcmask 261120   ;;  %s372_s0 = inlined_call_operand.vmem [shape: f32[2,32], index: 0, kind: input, shape index: {}]   ;;  %s373_s1 = inlined_call_operand.vmem [shape: f32[32,32], index: 1, kind: input, shape index: {}]   ;;  %s374_s2 = inlined_call_operand.vmem [shape: f32[1,32], index: 2, kind: input, shape index: {}]   ;;  %s375_s3 = inlined_call_operand.vmem [shape: f32[32,16], index: 3, kind: input, shape index: {}]   ;;  %s376_s4 = inlined_call_operand.vmem [shape: f32[1,16], index: 4, kind: input, shape index: {}]   ;;  %s377_s5 = inlined_call_operand.hbm [shape: f32[2,16], index: 5, kind: output, shape index: {}]  }
   0x1   :  { %v22_v0 = vld [vmem:[%s373_s1] sm:$0xff]  ;;  %v23_v1 = vld [vmem:[%s373_s1 + $0x8] sm:$0xff]  ;;  %247 = vmatprep.subr.bf16.mxu0 %v291_v2  ;;  %v24_v4 = vld [vmem:[%s373_s1 + $0x10] sm:$0xff]  ;;  %253 = vmatprep.subr.bf16.mxu1 %v291_v2  ;;  %vm193_vm2 = vcmask 130048  }
   0x2   :  { %v248_v3 = vpack.c.bf16 %v23_v1, %v22_v0  ;;  %v25_v5 = vld [vmem:[%s373_s1 + $0x18] sm:$0xff]  ;;  %233 = vmatprep.mubr.msk.f32.mxu0 %vm292_vm0, %v293_v6  ;;  %v108_v7 = vld [vmem:[%s375_s3] sm:$0xff]  ;;  %v109_v8 = vld [vmem:[%s375_s3 + $0x8] sm:$0xff]  ;;  %244 = vmatprep.mubr.msk.f32.mxu1 %vm292_vm0, %v293_v6 }
   0x3   :  { %v251_v9 = vpack.c.bf16 %v25_v5, %v24_v4  ;;  %v254_v10 = vpack.c.bf16 %v109_v8, %v108_v7  ;;  %v21_v11 = vld [vmem:[%s372_s0] sm:$0xff]  ;;  %v110_v12 = vld [vmem:[%s375_s3 + $0x10] sm:$0xff]  ;;  %v111_v13 = vld [vmem:[%s375_s3 + $0x18] sm:$0xff] }
   0x4   :  { %249 = vmatpush3.bf16.msra.mxu0 %v248_v3  ;;  %v257_v14 = vpack.c.bf16 %v111_v13, %v110_v12  ;;  %v211_v15 = vld [vmem:[%s374_s2] ss:$0 sm:$0xff] }
   0x5   :  { %250 = vmatprep.subr.bf16.mxu0 %v291_v2  ;;  %255 = vmatpush3.bf16.msra.mxu1 %v254_v10  ;;  %v213_v20 = vld [vmem:[%s376_s4] ss:$0 sm:$0xff] }
   0x6   :  { %256 = vmatprep.subr.bf16.mxu1 %v291_v2 }
   0x8   :  { %252 = vmatpush3.bf16.msra.mxu0 %v251_v9 }
   0x9   :  { %258 = vmatpush3.bf16.msra.mxu1 %v257_v14 }
   0xb   :  { %234 = vmatmul.mubr.msk.f32.vlgmr.msra.gmra.mrb[0].mxu0 %vm33_vm1, %v21_v11 }
  0xde   :  { %v103_v16 = vpop.f32.mrb[0].mxu0 }
  0xdf   :  { %v104_v17 = vadd.f32 %v211_v15, %v103_v16  ;;  %v235_v18 = vpop.f32.mrb[1].mxu0 }
  0xe1   :  { %v107_v19 = vmax.f32 %v104_v17, 0.0 }
  0xe3   :  { %245 = vmatmul.mubr.msk.f32.vlgmr.msra.gmra.mrb[0].mxu1 %vm33_vm1, %v107_v19 }
 0x1b6   :  { %v188_v21 = vpop.f32.mrb[0].mxu1 }
 0x1b7   :  { %v189_v22 = vadd.f32 %v213_v20, %v188_v21  ;;  %v246_v23 = vpop.f32.mrb[1].mxu1 }
 0x1b9   :  { %265 = vtanh.f32 %v189_v22 }
 0x1c3   :  { %v266_v24 = vpop.eup %265 }
 0x1c4   :  { %194 = vst.msk [vmem:[#allocation2] sm:$0xff] %vm193_vm2, %v266_v24 }
 0x1c5   :  { %199 = vsyncadd [#allocation3], 96  ;;  %s294_s3 = smov [#allocation2]  }
 0x1c6   :  { %s200_s13 = sshll.u32 %s294_s3, 4  ;;  %s201_s13 = int_to_ptr.vmem [resolvable:$true] %s200_s13 }
 0x1c7   :  { %s267_s2 = scalar_lea.vmem %s201_s13, 32  ;;  %s271_s14 = scalar_lea.vmem %s201_s13, 128 }
 0x1c8   :  { %p268_p0 = scmp.ne.s32.totalorder %s201_s13, %s267_s2  ;;  %p272_p1 = scmp.lt.s32.totalorder %s201_s13, %s201_s13 }
 0x1c9   :  { %p273_p2 = scmp.lt.s32.totalorder %s271_s14, %s267_s2 }
 0x1cb   :  { %p274_p3 = por %p273_p2, %p272_p1 }
 0x1cd   :  { %p275_p4 = pnand %p274_p3, %p268_p0 }
 0x1cf   :  { %278 = shalt.err (!%p275_p4)
}
 0x1d0   :  { %s279_s16 = scalar_lea.hbm %s377_s5, 32 }
 0x1d1   :  { %p280_p5 = scmp.ne.s32.totalorder %s377_s5, %s279_s16  ;;  %p283_p6 = scmp.lt.u32.totalorder %s279_s16, %s377_s5 }
 0x1d3   :  { %p285_p7 = pnand %p283_p6, %p280_p5 }
 0x1d5   :  { %288 = shalt.err (!%p285_p7)
}
 0x1d6   :  { %s295_s21 = smov 32   ;;  %s296_s22 = smov 2  }
 0x1d7   :  { %206 = dma.vmem_to_hbm [thread:$0]  %s201_s13, 32, %s377_s5, [#allocation3], %s295_s21, %s295_s21, %s296_s22  }
 0x1d8   :  { %289 = dma.done.wait [#allocation3], 128  }
 0x1d9   :  { %290 = vsyncadd [#allocation3], 4294967168 }
 0x1da   :  { %210 = vsyncpa [#allocation3], 1 }

</bundles_post_ra>
